<compile_context>
chip_gen: v6e
topology: v6e:2x2x1
jax: 0.10.0
libtpu: 0.0.40
codegen_flags: <defaults>
</compile_context>

<pallas_src>
import functools

import jax
import jax.numpy as jnp
from jax.experimental import pallas as pl
from jax.experimental.pallas import tpu as pltpu


def _round_up(x, m):
    return ((x + m - 1) // m) * m


def _choose_tile_rows(batch_rows, num_classes):
    # Keep the per-tile f32 working set around <= 4 MiB so the native-dtype
    # input double-buffer + in-kernel f32 temporaries stay well under the
    # 48 MiB scoped VMEM we request (safe on v5e/v6e/v7x).
    budget_bytes = 4 * 1024 * 1024
    tb = budget_bytes // max(1, num_classes * 4)
    tb = max(8, (tb // 8) * 8)
    tb = min(tb, 1024)
    tb = min(tb, _round_up(batch_rows, 8))
    return tb


def _ls_ce_kernel(logits_ref, target_ref, out_ref, *, smoothing):
    # logits_ref: (TB, C) native dtype (bf16/f16/f32) in VMEM
    # target_ref: (TB, 1) int32 in VMEM
    # out_ref:    (TB, 1) f32 per-row loss contributions
    x = logits_ref[...].astype(jnp.float32)            # (TB, C) f32 compute
    t = target_ref[...]                                 # (TB, 1) int32
    tb, c = x.shape

    # Numerically stable log-sum-exp along the class (lane) axis.
    m = jnp.max(x, axis=-1, keepdims=True)              # (TB, 1)
    shifted = x - m                                      # (TB, C)
    lse = jnp.log(jnp.sum(jnp.exp(shifted), axis=-1, keepdims=True))  # (TB, 1)

    # Fused weighted reduction: w = s/C + (1-s) * onehot(target).
    col = jax.lax.broadcasted_iota(jnp.int32, (tb, c), 1)
    onehot = (col == t).astype(jnp.float32)              # (TB, C)
    w = jnp.float32(smoothing / c) + jnp.float32(1.0 - smoothing) * onehot
    weighted = jnp.sum(shifted * w, axis=-1, keepdims=True)  # (TB, 1)

    # contrib_b = (s/C) * (-sum_c log_preds) + (1-s) * (-log_preds[target])
    #           = lse_b - sum_c(shifted * w)
    out_ref[...] = lse - weighted


def label_smoothing_cross_entropy(output, target, smoothing=0.1, reduction="mean"):
    """output: (B, C) float (any dtype); target: (B,) int.

    reduction: 'mean' | 'sum' | 'none' (matches the PyTorch module).
    """
    B, C = output.shape
    tb = _choose_tile_rows(B, C)
    b_pad = _round_up(B, tb)
    num_tiles = b_pad // tb

    target_col = target.astype(jnp.int32).reshape(B, 1)
    if b_pad != B:
        # Padded rows compute finite garbage and are sliced off below.
        output = jnp.pad(output, ((0, b_pad - B), (0, 0)))
        target_col = jnp.pad(target_col, ((0, b_pad - B), (0, 0)))

    kernel = functools.partial(_ls_ce_kernel, smoothing=float(smoothing))

    per_row = pl.pallas_call(
        kernel,
        out_shape=jax.ShapeDtypeStruct((b_pad, 1), jnp.float32),
        grid=(num_tiles,),
        in_specs=[
            pl.BlockSpec((tb, C), lambda i: (i, 0)),   # logits tile (native dtype)
            pl.BlockSpec((tb, 1), lambda i: (i, 0)),   # target column tile
        ],
        out_specs=pl.BlockSpec((tb, 1), lambda i: (i, 0)),
        compiler_params=pltpu.CompilerParams(
            dimension_semantics=("parallel",),          # tiles independent -> megacore
            vmem_limit_bytes=48 * 1024 * 1024,
        ),
    )(output, target_col)

    per_row = per_row[:B, 0]                             # drop batch padding
    if reduction == "mean":
        return jnp.sum(per_row) / jnp.float32(B)
    elif reduction == "sum":
        return jnp.sum(per_row)
    else:  # 'none'
        return per_row


def _reference(output, target, smoothing=0.1, reduction="mean"):
    # Pure-JAX reference of the PyTorch forward.
    B, C = output.shape
    log_preds = jax.nn.log_softmax(output.astype(jnp.float32), axis=-1)
    nll_per = -jnp.take_along_axis(log_preds, target[:, None], axis=-1)[:, 0]
    if reduction == "sum":
        loss = -jnp.sum(log_preds)
        nll = jnp.sum(nll_per)
    elif reduction == "mean":
        loss = jnp.mean(-jnp.sum(log_preds, axis=-1))
        nll = jnp.mean(nll_per)
    else:
        loss = -jnp.sum(log_preds, axis=-1)
        nll = nll_per
    return loss * smoothing / C + (1.0 - smoothing) * nll


if __name__ == "__main__":
    key = jax.random.PRNGKey(0)
    k1, k2, k3, k4 = jax.random.split(key, 4)

    # Case 1: small, tile-aligned batch (mean reduction).
    B, C = 8, 32
    logits = jax.random.normal(k1, (B, C), dtype=jnp.float32)
    target = jax.random.randint(k2, (B,), 0, C, dtype=jnp.int32)
    loss = jax.block_until_ready(label_smoothing_cross_entropy(logits, target))
    ref = _reference(logits, target)
    assert jnp.allclose(loss, ref, atol=1e-5, rtol=1e-5), (loss, ref)

    # Case 2: batch not a multiple of the tile (exercises padding path), sum reduction.
    B2, C2 = 13, 40
    logits2 = jax.random.normal(k3, (B2, C2), dtype=jnp.float32)
    target2 = jax.random.randint(k4, (B2,), 0, C2, dtype=jnp.int32)
    loss2 = jax.block_until_ready(
        label_smoothing_cross_entropy(logits2, target2, reduction="sum"))
    ref2 = _reference(logits2, target2, reduction="sum")
    assert jnp.allclose(loss2, ref2, atol=1e-4, rtol=1e-5), (loss2, ref2)

    print("KERNEL_OK")
</pallas_src>

<mosaic_0001>
module attributes {stable_mosaic.version = 11 : i64} {
  func.func @_ls_ce_kernel(%arg0: i32, %arg1: memref<8x32xf32, #tpu.memory_space<vmem>>, %arg2: memref<8x1xi32, #tpu.memory_space<vmem>>, %arg3: memref<8x1xf32, #tpu.memory_space<vmem>>) attributes {dimension_semantics = [#tpu.dimension_semantics<parallel>], iteration_bounds = array<i64: 1>, scalar_prefetch = 0 : i64, scratch_operands = 0 : i64, tpu.core_type = #tpu.core_type<tc>, window_params = [{transform_indices = @transform_0, window_bounds = array<i64: 8, 32>}, {transform_indices = @transform_1, window_bounds = array<i64: 8, 1>}, {transform_indices = @transform_2, window_bounds = array<i64: 8, 1>}]} {
    %c0 = arith.constant 0 : index
    %c0_0 = arith.constant 0 : index
    %0 = vector.load %arg1[%c0, %c0_0] : memref<8x32xf32, #tpu.memory_space<vmem>>, vector<8x32xf32>
    %c0_1 = arith.constant 0 : index
    %c0_2 = arith.constant 0 : index
    %1 = vector.load %arg2[%c0_1, %c0_2] : memref<8x1xi32, #tpu.memory_space<vmem>>, vector<8x1xi32>
    %cst = arith.constant dense<0xFF800000> : vector<8xf32>
    %2 = vector.multi_reduction <maximumf>, %0, %cst [1] : vector<8x32xf32> to vector<8xf32>
    %3 = vector.shape_cast %2 : vector<8xf32> to vector<8x1xf32>
    %4 = vector.broadcast %3 : vector<8x1xf32> to vector<8x32xf32>
    %5 = arith.subf %0, %4 : vector<8x32xf32>
    %6 = math.exp %5 : vector<8x32xf32>
    %cst_3 = arith.constant dense<0.000000e+00> : vector<8xf32>
    %7 = vector.multi_reduction <add>, %6, %cst_3 [1] : vector<8x32xf32> to vector<8xf32>
    %8 = vector.shape_cast %7 : vector<8xf32> to vector<8x1xf32>
    %9 = math.log %8 : vector<8x1xf32>
    %10 = tpu.iota {dimensions = array<i32: 1>} : vector<8x32xi32>
    %11 = vector.broadcast %1 : vector<8x1xi32> to vector<8x32xi32>
    %12 = arith.cmpi eq, %10, %11 : vector<8x32xi32>
    %13 = arith.extui %12 : vector<8x32xi1> to vector<8x32xi32>
    %14 = arith.sitofp %13 : vector<8x32xi32> to vector<8x32xf32>
    %cst_4 = arith.constant 0.899999976 : f32
    %15 = vector.broadcast %cst_4 : f32 to vector<8x32xf32>
    %16 = arith.mulf %15, %14 : vector<8x32xf32>
    %cst_5 = arith.constant 3.125000e-03 : f32
    %17 = vector.broadcast %cst_5 : f32 to vector<8x32xf32>
    %18 = arith.addf %17, %16 : vector<8x32xf32>
    %19 = arith.mulf %5, %18 : vector<8x32xf32>
    %cst_6 = arith.constant dense<0.000000e+00> : vector<8xf32>
    %20 = vector.multi_reduction <add>, %19, %cst_6 [1] : vector<8x32xf32> to vector<8xf32>
    %21 = vector.shape_cast %20 : vector<8xf32> to vector<8x1xf32>
    %22 = arith.subf %9, %21 : vector<8x1xf32>
    %c0_7 = arith.constant 0 : index
    %c0_8 = arith.constant 0 : index
    %23 = vector.load %arg3[%c0_7, %c0_8] : memref<8x1xf32, #tpu.memory_space<vmem>>, vector<8x1xf32>
    tpu.vector_store %arg3[%c0_7, %c0_8], %22 {strides = array<i32>} : memref<8x1xf32, #tpu.memory_space<vmem>>, vector<8x1xf32>,
    return
  }
  func.func @transform_0(%arg0: i32) -> (i32, i32) {
    %c0_i32 = arith.constant 0 : i32
    %c0_i32_0 = arith.constant 0 : i32
    return %arg0, %c0_i32 : i32, i32
  }
  func.func @transform_1(%arg0: i32) -> (i32, i32) {
    %c0_i32 = arith.constant 0 : i32
    %c0_i32_0 = arith.constant 0 : i32
    return %arg0, %c0_i32 : i32, i32
  }
  func.func @transform_2(%arg0: i32) -> (i32, i32) {
    %c0_i32 = arith.constant 0 : i32
    %c0_i32_0 = arith.constant 0 : i32
    return %arg0, %c0_i32 : i32, i32
  }
}

</mosaic_0001>

<bundles_post_ra>
// kernel: tpu_custom_call.1
= control target key start
LH: loop header
LB: loop body
LE: loop exit
PB: predicated region body
PF: predicated region fallthrough
CT: control target
= control target key end

     0   :  { %vm13_vm0 = vcmask 261120   ;;  %v54_v1 = vmov 0   ;;  %v25_v6 = vlaneseq  ;;  %v55_v10 = vmov 0.0   ;;  %s83_s0 = inlined_call_operand.vmem [shape: f32[8,32], index: 0, kind: input, shape index: {}]   ;;  %s84_s1 = inlined_call_operand.vmem [shape: s32[8,1], index: 1, kind: input, shape index: {}]   ;;  %s85_s2 = inlined_call_operand.vmem [shape: f32[8,1], index: 2, kind: output, shape index: {}]  }
   0x1   :  { %v11_v0 = vld [vmem:[%s83_s0] sm:$0xff]  ;;  %49 = vset.pattern.permute.xlu0 %v54_v1  ;;  %vm40_vm2 = vcmask 7168  }
   0x2   :  { %v14_v2 = vsel %vm13_vm0, %v11_v0, -inf  ;;  %v12_v3 = vld [vmem:[%s84_s1] sm:$0xff]  ;;  %v26_v8 = vand.u32 127, %v25_v6 }
   0x3   :  { %15 = vmax.xlane.f32.xlu0 %v14_v2 }
  0x19   :  { %28 = vperm.xlu0 %49, %v12_v3  }
  0x8c   :  { %v16_v4 = vpop.xlane.xlu0 %15 }
  0x8d   :  { %v17_v5 = vsub.f32 %v11_v0, %v16_v4 }
  0x8f   :  { %v18_v7 = vmul.f32 1.442695, %v17_v5 }
  0x91   :  { %50 = vpow2.f32 %v18_v7 }
  0x94   :  { %v29_v9 = vpop.permute.xlu0 %28 }
  0x95   :  { %vm30_vm1 = vcmp.eq.s32.totalorder %v26_v8, %v29_v9 }
  0x96   :  { %v46_v11 = vsel %vm30_vm1, 1.0, %v55_v10 }
  0x97   :  { %v33_v12 = vmul.f32 0.9, %v46_v11 }
  0x99   :  { %v34_v13 = vadd.f32 0.003125, %v33_v12 }
  0x9b   :  { %v35_v16 = vmul.f32 %v34_v13, %v17_v5 }
  0x9d   :  { %v36_v17 = vsel %vm13_vm0, %v35_v16, 0.0 }
  0x9e   :  { %v51_v14 = vpop.eup %50 }
  0x9f   :  { %v20_v15 = vsel %vm13_vm0, %v51_v14, 0.0 }
  0xa0   :  { %21 = vadd.xlane.f32.xlu1 %v20_v15 }
  0xa4   :  { %37 = vadd.xlane.f32.xlu1 %v36_v17 }
 0x129   :  { %v22_v18 = vpop.xlane.xlu1 %21 }
 0x12a   :  { %52 = vlog2.f32 %v22_v18 }
 0x12d   :  { %v38_v21 = vpop.xlane.xlu1 %37 }
 0x137   :  { %v53_v19 = vpop.eup %52 }
 0x138   :  { %v24_v20 = vmul.f32 0.6931472, %v53_v19 }
 0x13a   :  { %v39_v22 = vsub.f32 %v24_v20, %v38_v21 }
 0x13c   :  { %41 = vst.msk [vmem:[%s85_s2] sm:$0xff] %vm40_vm2, %v39_v22 }

</bundles_post_ra>
